<compile_context>
chip_gen: v7x
topology: tpu7x:2x2x1
jax: 0.10.0
libtpu: 0.0.40
codegen_flags: <defaults>
</compile_context>

<pallas_src>
import jax
import jax.numpy as jnp
from jax.experimental import pallas as pl
from jax.experimental.pallas import tpu as pltpu


def _round_up(a, b):
    return (a + b - 1) // b * b


def _pool_conv_kernel(x_ref, w_ref, shift_ref, o_ref):
    # x_ref: (1, K, T) transposed-patch tile; w_ref: (C_out, K) BN-folded weight;
    # shift_ref: (C_out, 1) folded bias/BN shift; o_ref: (1, C_out, T).
    acc = jnp.dot(w_ref[...], x_ref[0],
                  preferred_element_type=jnp.float32)        # MXU, (C_out, T)
    y = acc + shift_ref[...]                                 # broadcast over lanes
    o_ref[0] = jnp.maximum(y, 0.0).astype(o_ref.dtype)       # lane-dense store


def pool_conv_forward(x, weight, bias, gamma, beta, running_mean, running_var,
                      *, eps=1e-5, kernel_size=2, stride=2, lane_tile=1024):
    """x: NCHW float32. weight: (C_out, C_in, 2, 2). Returns NCHW float32."""
    N, C_in, H, W = x.shape
    C_out = weight.shape[0]
    assert kernel_size == stride == 2 and H % 2 == 0 and W % 2 == 0
    Ho, Wo = H // 2, W // 2
    K = C_in * 4
    M_sp = Ho * Wo

    # Fold BatchNorm (inference mode) + conv bias into the weight and one shift.
    # TODO(synk): training-mode batch statistics are not computed here.
    scale = gamma / jnp.sqrt(running_var + eps)
    w_folded = (weight.reshape(C_out, K) * scale[:, None]).astype(jnp.float32)
    shift = ((bias - running_mean) * scale + beta).reshape(C_out, 1).astype(jnp.float32)

    # Single relayout pass: NCHW -> (N, K, Ho*Wo), K index = c*4 + dh*2 + dw
    # (matches weight.reshape(C_out, K) ordering).
    xt = x.reshape(N, C_in, Ho, 2, Wo, 2)
    xt = jnp.transpose(xt, (0, 1, 3, 5, 2, 4)).reshape(N, K, M_sp)
    # TODO(synk): fuse this 2x2/stride-2 gather into the kernel (pl.ANY + manual
    # strided DMA) to remove the extra |x| read+write HBM pass entirely.

    # Lane tile: large multiple of 128 so output stores are unmasked; pad the
    # spatial dim up to the tile instead of shrinking the tile.
    if M_sp >= lane_tile:
        t_sp = lane_tile
    elif M_sp >= 128:
        t_sp = _round_up(M_sp, 128)
    else:
        t_sp = M_sp                       # full-dim block (small inputs)
    M_pad = _round_up(M_sp, t_sp)
    if M_pad != M_sp:
        xt = jnp.pad(xt, ((0, 0), (0, 0), (0, M_pad - M_sp)))

    grid = (N, M_pad // t_sp)
    # NOTE: for very large C_in (K*t_sp*4B per buffer), shrink lane_tile or set
    # vmem_limit_bytes; with typical K this stays far below the scoped VMEM limit.

    out_pad = pl.pallas_call(
        _pool_conv_kernel,
        out_shape=jax.ShapeDtypeStruct((N, C_out, M_pad), jnp.float32),
        grid_spec=pltpu.PrefetchScalarGridSpec(
            num_scalar_prefetch=0,
            grid=grid,
            in_specs=[
                pl.BlockSpec((1, K, t_sp), lambda n, j: (n, 0, j)),
                pl.BlockSpec((C_out, K), lambda n, j: (0, 0)),
                pl.BlockSpec((C_out, 1), lambda n, j: (0, 0)),
            ],
            out_specs=pl.BlockSpec((1, C_out, t_sp), lambda n, j: (n, 0, j)),
        ),
        compiler_params=pltpu.CompilerParams(
            dimension_semantics=("parallel", "parallel")),
    )(xt, w_folded, shift)

    out = out_pad[:, :, :M_sp] if M_pad != M_sp else out_pad
    # (N, C_out, Ho*Wo) reshapes to NCHW for free — no output transpose pass.
    return out.reshape(N, C_out, Ho, Wo)


def _reference_forward(x, weight, bias, gamma, beta, running_mean, running_var, eps=1e-5):
    # Pure-JAX reference (lax.conv) for correctness checking.
    y = jax.lax.conv_general_dilated(
        x, weight, window_strides=(2, 2), padding="VALID",
        dimension_numbers=("NCHW", "OIHW", "NCHW"))
    y = y + bias[None, :, None, None]
    scale = gamma / jnp.sqrt(running_var + eps)
    shift = beta - running_mean * scale
    y = y * scale[None, :, None, None] + shift[None, :, None, None]
    return jnp.maximum(y, 0.0)


if __name__ == "__main__":
    key = jax.random.PRNGKey(0)
    k_x, k_w, k_b, k_g, k_be, k_m, k_v = jax.random.split(key, 7)

    N, C_in, H, W = 2, 4, 16, 16
    C_out = 8

    x = jax.random.normal(k_x, (N, C_in, H, W), dtype=jnp.float32)
    weight = jax.random.normal(k_w, (C_out, C_in, 2, 2), dtype=jnp.float32) * 0.1
    bias = jax.random.normal(k_b, (C_out,), dtype=jnp.float32) * 0.1
    gamma = 1.0 + 0.1 * jax.random.normal(k_g, (C_out,), dtype=jnp.float32)
    beta = 0.1 * jax.random.normal(k_be, (C_out,), dtype=jnp.float32)
    running_mean = 0.1 * jax.random.normal(k_m, (C_out,), dtype=jnp.float32)
    running_var = jnp.abs(1.0 + 0.1 * jax.random.normal(k_v, (C_out,), dtype=jnp.float32))

    fwd = jax.jit(pool_conv_forward)
    out = jax.block_until_ready(
        fwd(x, weight, bias, gamma, beta, running_mean, running_var))

    ref = _reference_forward(x, weight, bias, gamma, beta, running_mean, running_var)
    assert out.shape == (N, C_out, H // 2, W // 2), out.shape
    assert jnp.allclose(out, ref, atol=1e-4, rtol=1e-4), float(jnp.max(jnp.abs(out - ref)))

    print("KERNEL_OK")
</pallas_src>

<mosaic_0001>
module attributes {stable_mosaic.version = 11 : i64} {
  func.func @_pool_conv_kernel(%arg0: i32, %arg1: i32, %arg2: memref<1x16x64xf32, #tpu.memory_space<vmem>>, %arg3: memref<8x16xf32, #tpu.memory_space<vmem>>, %arg4: memref<8x1xf32, #tpu.memory_space<vmem>>, %arg5: memref<1x8x64xf32, #tpu.memory_space<vmem>>) attributes {dimension_semantics = [#tpu.dimension_semantics<parallel>, #tpu.dimension_semantics<parallel>], iteration_bounds = array<i64: 2, 1>, scalar_prefetch = 0 : i64, scratch_operands = 0 : i64, tpu.core_type = #tpu.core_type<tc>, window_params = [{transform_indices = @transform_0, window_bounds = array<i64: 1, 16, 64>}, {pipeline_mode = #tpu.pipeline_mode<synchronous>, transform_indices = @transform_1, window_bounds = array<i64: 8, 16>}, {pipeline_mode = #tpu.pipeline_mode<synchronous>, transform_indices = @transform_2, window_bounds = array<i64: 8, 1>}, {transform_indices = @transform_3, window_bounds = array<i64: 1, 8, 64>}]} {
    %c0 = arith.constant 0 : index
    %c0_0 = arith.constant 0 : index
    %0 = vector.load %arg3[%c0, %c0_0] : memref<8x16xf32, #tpu.memory_space<vmem>>, vector<8x16xf32>
    %c0_1 = arith.constant 0 : index
    %c0_2 = arith.constant 0 : index
    %c0_3 = arith.constant 0 : index
    %1 = vector.load %arg2[%c0_1, %c0_2, %c0_3] : memref<1x16x64xf32, #tpu.memory_space<vmem>>, vector<1x16x64xf32>
    %2 = vector.shape_cast %1 : vector<1x16x64xf32> to vector<16x64xf32>
    %cst = arith.constant dense<0.000000e+00> : vector<8x64xf32>
    %3 = tpu.matmul %0, %2, %cst {dimension_numbers = #tpu.dot_dimension_numbers<[1], [0], [0], [1], [0, 0, 1, 1], [], []>} : vector<8x16xf32>, vector<16x64xf32>, vector<8x64xf32> -> vector<8x64xf32>
    %c0_4 = arith.constant 0 : index
    %c0_5 = arith.constant 0 : index
    %4 = vector.load %arg4[%c0_4, %c0_5] : memref<8x1xf32, #tpu.memory_space<vmem>>, vector<8x1xf32>
    %5 = vector.broadcast %4 : vector<8x1xf32> to vector<8x64xf32>
    %6 = arith.addf %3, %5 : vector<8x64xf32>
    %cst_6 = arith.constant 0.000000e+00 : f32
    %7 = vector.broadcast %cst_6 : f32 to vector<8x64xf32>
    %8 = arith.maximumf %6, %7 : vector<8x64xf32>
    %c0_7 = arith.constant 0 : index
    %c0_8 = arith.constant 0 : index
    %c0_9 = arith.constant 0 : index
    %9 = vector.load %arg5[%c0_7, %c0_8, %c0_9] : memref<1x8x64xf32, #tpu.memory_space<vmem>>, vector<1x8x64xf32>
    %10 = vector.shape_cast %9 : vector<1x8x64xf32> to vector<8x64xf32>
    %11 = vector.shape_cast %8 : vector<8x64xf32> to vector<1x8x64xf32>
    tpu.vector_store %arg5[%c0_7, %c0_8, %c0_9], %11 {strides = array<i32>} : memref<1x8x64xf32, #tpu.memory_space<vmem>>, vector<1x8x64xf32>,
    return
  }
  func.func @transform_0(%arg0: i32, %arg1: i32) -> (i32, i32, i32) {
    %c0_i32 = arith.constant 0 : i32
    %c0_i32_0 = arith.constant 0 : i32
    return %arg0, %c0_i32, %arg1 : i32, i32, i32
  }
  func.func @transform_1(%arg0: i32, %arg1: i32) -> (i32, i32) {
    %c0_i32 = arith.constant 0 : i32
    %c0_i32_0 = arith.constant 0 : i32
    %c0_i32_1 = arith.constant 0 : i32
    return %c0_i32, %c0_i32_0 : i32, i32
  }
  func.func @transform_2(%arg0: i32, %arg1: i32) -> (i32, i32) {
    %c0_i32 = arith.constant 0 : i32
    %c0_i32_0 = arith.constant 0 : i32
    %c0_i32_1 = arith.constant 0 : i32
    return %c0_i32, %c0_i32_0 : i32, i32
  }
  func.func @transform_3(%arg0: i32, %arg1: i32) -> (i32, i32, i32) {
    %c0_i32 = arith.constant 0 : i32
    %c0_i32_0 = arith.constant 0 : i32
    return %arg0, %c0_i32, %arg1 : i32, i32, i32
  }
}

</mosaic_0001>

<bundles_post_ra>
// kernel: pool_conv_forward.1
= control target key start
LH: loop header
LB: loop body
LE: loop exit
PB: predicated region body
PF: predicated region fallthrough
CT: control target
= control target key end

     0   :  { %s465_s12 = smov 0   ;;  %s467_s13 = smov 0   ;;  %s504_s0 = inlined_call_operand.vmem [shape: f32[2,16,64], index: 0, kind: input, shape index: {}]   ;;  %s505_s1 = inlined_call_operand.vmem [shape: f32[8,16], index: 1, kind: input, shape index: {}]   ;;  %s506_s2 = inlined_call_operand.vmem [shape: f32[8,1], index: 2, kind: input, shape index: {}]   ;;  %s507_s3 = inlined_call_operand.vmem [shape: f32[2,8,64], index: 3, kind: output, shape index: {}]  }
   0x1   :  { %s469_s14 = smov 0  }
   0x2 LB: > { %s25_s15 = sadd.s32 1, %s435_s13  ;;  %p367_p0 = scmp.ge.s32.totalorder %s439_s14, 1  ;;  %s439_s14 = sphi %s469_s14, %s13_s14   ;;  %s435_s13 = sphi %s467_s13, %s509_s13   ;;  %s431_s12 = sphi %s465_s12, %s508_s12  }
   0x3   : > { %p27_p1 = scmp.ge.s32.totalorder %s25_s15, 2  ;;  %p156_p2 = scmp.lt.s32.totalorder %s439_s14, 3 }
   0x5   : > { %s511_s15 = smov (%p27_p1, %s25_s15), 0  ;;  %p157_p3 = pnand %p367_p0, %p156_p2 }
   0x6   : > { %p185_p4 = scmp.lt.s32.totalorder (!%p157_p3), %s431_s12, 1  ;;  %v441_v0 = vmov (!%p157_p3), 0.0|0.0   ;;  %vm442_vm0 = vmmov (!%p157_p3), 0   ;;  %v443_v1 = vmov (!%p157_p3), 0.0   ;;  %v203_v2 = vld [vmem:[%s506_s2] sm:$0xff] (!%p157_p3)  ;;  %v444_v3 = vmov (!%p157_p3), 0  }
   0x7   : > { %160 = sbr.rel (%p157_p3) target bundleno = 240 (0xf0), region = 32  ;;  %385 = vmatprep.subr.bf16.mxu0 (!%p157_p3), %v441_v0  ;;  %382 = vmatprep.mubr.msk.f32.mxu0 (!%p157_p3), %vm442_vm0, %v443_v1  ;;  %v200_v7 = vld [vmem:[%s505_s1] sm:$0xff] (!%p157_p3)  ;;  %vm209_vm1 = vcmask (!%p157_p3), 130048   ;;  %vm284_vm2 = vcmask (!%p157_p3), 523264  }
   0x8   : > { %416 = vset.pattern.permute.xlu0 (!%p157_p3), %v444_v3 }
   0x9   : > { %206 = vperm.xlu0 (!%p157_p3), %416, %v203_v2  }
   0xe   : > { %s513_s12 = smov (!%p185_p4, %s431_s12), 1 }
   0xf   : > { %s374_s18 = sshll.u32 %s513_s12, 4  ;;  %s370_s24 = sshll.u32 %s513_s12, 3 }
  0x10   : > { %s192_s21 = scalar_lea.vmem %s504_s0, %s374_s18  ;;  %s199_s27 = scalar_lea.vmem %s507_s3, %s370_s24 }
  0x11   : > { %v201_v4 = vld [vmem:[%s192_s21] sm:$0xff]  ;;  %v202_v5 = vld [vmem:[%s192_s21 + $0x8] sm:$0xff] }
  0x12   : > { %v386_v6 = vpack.c.bf16 %v202_v5, %v201_v4 }
  0x14   : > { %387 = vmatpush3.bf16.msra.mxu0 %v386_v6 }
  0x17   : > { %383 = vmatmul.mubr.msk.f32.vlgmr.msra.gmra.mrb[0].mxu0 %vm209_vm1, %v200_v7 }
  0x88   : > { %v207_v8 = vpop.permute.xlu0 %206 }
  0xea   : > { %v279_v9 = vpop.f32.mrb[0].mxu0 }
  0xeb   : > { %v280_v10 = vadd.f32 %v279_v9, %v207_v8  ;;  %v384_v11 = vpop.f32.mrb[1].mxu0 }
  0xed   : > { %v283_v12 = vmax.f32 %v280_v10, 0.0 }
  0xef   : > { %285 = vst.msk [vmem:[%s199_s27] sm:$0xff] %vm284_vm2, %v283_v12 }
  0xf0 PF: > { %s13_s14 = sadd.s32 1, %s439_s14   ;;  %s508_s12 = smov %s435_s13 }
  0xf1   : > { %p10_p5 = scmp.ge.s32.totalorder %s13_s14, 4   ;;  %s509_s13 = smov %s511_s15 }
  0xf3   :  { %12 = sbr.rel (!%p10_p5) target bundleno = 2 (0x2), region = 62 }

</bundles_post_ra>
